<compile_context>
chip_gen: v6e
topology: v6e:2x2x1
jax: 0.10.0
libtpu: 0.0.40
codegen_flags: <defaults>
</compile_context>

<pallas_src>
import functools

import jax
import jax.numpy as jnp
from jax.experimental import pallas as pl
from jax.experimental.pallas import tpu as pltpu


def _round_up(n, m):
    return ((n + m - 1) // m) * m


_BUFFERED = getattr(pl, "Buffered", None)


def _weight_spec(shape, index_map, single_buffer):
    """BlockSpec for a weight operand; single-buffer it when its index is constant."""
    if single_buffer and _BUFFERED is not None:
        try:
            return pl.BlockSpec(shape, index_map, pipeline_mode=_BUFFERED(1))
        except TypeError:  # older jax without pipeline_mode kwarg
            pass
    return pl.BlockSpec(shape, index_map)


def _ensemble_kernel(x_ref, w1_ref, b1_ref, w2_ref, b2_ref, o_ref, acc_ref, *,
                     agg, members_per_tile, hidden, o_pad, compute_dtype):
    """One (batch tile, K tile) step of the fused 2-layer ensemble MLP.

    Grid = (batch tiles [parallel], E*H tiles [arbitrary/reduction]).
    """
    k = pl.program_id(1)

    @pl.when(k == 0)
    def _():
        if agg == "max":
            acc_ref[...] = jnp.full_like(acc_ref, -jnp.inf)
        else:
            acc_ref[...] = jnp.zeros_like(acc_ref)

    # Layer 1 on this K-slice of the fused (D_pad, E*H) weights.
    # x arrives in f32 (no wrapper cast); the in-VPU cast is free under the MXU.
    x = x_ref[...].astype(compute_dtype)
    h = jnp.dot(x, w1_ref[...], preferred_element_type=jnp.float32)
    h = jnp.maximum(h + b1_ref[...], 0.0)          # bias + ReLU in f32 (v5e-safe)
    h = h.astype(compute_dtype)

    if agg == "max":
        # Per-member K-slice matmuls + running max (no block-diagonal zero FLOPs).
        m = acc_ref[...]
        for e in range(members_per_tile):
            he = h[:, e * hidden:(e + 1) * hidden]
            w2e = w2_ref[e * hidden:(e + 1) * hidden, :]
            be = b2_ref[:, e * o_pad:(e + 1) * o_pad]
            m = jnp.maximum(
                m, jnp.dot(he, w2e, preferred_element_type=jnp.float32) + be)
        acc_ref[...] = m
    else:
        # 'mean'/'weighted': aggregation weights already folded into W2/b2.
        acc_ref[...] += jnp.dot(h, w2_ref[...],
                                preferred_element_type=jnp.float32)

    @pl.when(k == pl.num_programs(1) - 1)
    def _():
        if agg == "max":
            o_ref[...] = acc_ref[...]
        else:
            o_ref[...] = acc_ref[...] + b2_ref[...]


def prepare_ensemble(params, aggregation_method="mean", ensemble_weights=None,
                     compute_dtype=jnp.bfloat16):
    """Build fused, lane-dense, bf16 weights ONCE per parameter set.

    params: (W1 (E,D,H), b1 (E,H), W2 (E,H,O), b2 (E,O))
    Returns (fused_arrays, meta) to pass to ensemble_forward.
    """
    w1, b1, w2, b2 = params
    E, D, H = w1.shape
    O = w2.shape[2]
    D_pad = _round_up(D, 128)   # lane-dense x tile / MXU-aligned layer-1 K
    O_pad = _round_up(O, 128)   # lane-dense (unmasked vst) output store

    # Layer 1 fused over the ensemble: (D_pad, E*H), member e in columns [e*H,(e+1)*H).
    w1f = jnp.transpose(w1, (1, 0, 2)).reshape(D, E * H)
    w1f = jnp.pad(w1f, ((0, D_pad - D), (0, 0))).astype(compute_dtype)
    b1f = b1.reshape(1, E * H).astype(jnp.float32)

    if aggregation_method in ("mean", "weighted"):
        if aggregation_method == "mean":
            agg_w = jnp.full((E,), 1.0 / E, jnp.float32)
        else:
            if ensemble_weights is None:
                # PyTorch init: nn.Parameter(torch.ones(E)/E)
                ensemble_weights = jnp.ones((E,), jnp.float32) / E
            agg_w = jax.nn.softmax(ensemble_weights.astype(jnp.float32), axis=0)
        # sum_e w_e*(h_e @ W2_e + b2_e) == h_all @ concat_e(w_e*W2_e) + sum_e w_e*b2_e
        w2f = (w2.astype(jnp.float32) * agg_w[:, None, None]).reshape(E * H, O)
        w2f = jnp.pad(w2f, ((0, 0), (0, O_pad - O))).astype(compute_dtype)
        b2f = jnp.pad((b2.astype(jnp.float32) * agg_w[:, None]).sum(0),
                      (0, O_pad - O)).reshape(1, O_pad)
    elif aggregation_method == "max":
        # Lane-dense per-member stack: member e occupies rows [e*H,(e+1)*H) of W2
        # and lanes [e*O_pad,(e+1)*O_pad) of b2. Padded O columns stay exactly 0.
        w2f = jnp.pad(w2.astype(jnp.float32),
                      ((0, 0), (0, 0), (0, O_pad - O))).reshape(E * H, O_pad)
        w2f = w2f.astype(compute_dtype)
        b2f = jnp.pad(b2.astype(jnp.float32),
                      ((0, 0), (0, O_pad - O))).reshape(1, E * O_pad)
    else:
        raise ValueError(f"Unknown aggregation method: {aggregation_method}")

    meta = dict(agg=aggregation_method, E=E, D=D, H=H, O=O,
                D_pad=D_pad, O_pad=O_pad, compute_dtype=compute_dtype)
    return (w1f, b1f, w2f, b2f), meta


def ensemble_forward(x, prepared, *, batch_block=256, k_block=512):
    """Ensemble forward with one pallas_call (x: (B, D) f32)."""
    (w1f, b1f, w2f, b2f), meta = prepared
    agg = meta["agg"]
    E, D, H, O = meta["E"], meta["D"], meta["H"], meta["O"]
    D_pad, O_pad = meta["D_pad"], meta["O_pad"]
    cdt = meta["compute_dtype"]
    EH = E * H
    B = x.shape[0]

    # ---- batch tiling: aim for >=2 parallel steps (v7x has 2 TensorCores) ----
    tb = max(8, min(batch_block, _round_up((B + 1) // 2, 8)))
    B_pad = _round_up(B, tb)
    nb = B_pad // tb

    # ---- K tiling over the fused E*H axis (layer-1 N / layer-2 K) ------------
    if EH <= k_block:
        tk = EH
    else:
        tk = EH  # fallback: single K step if no aligned divisor found
        cand = 128
        while cand <= k_block:
            if EH % cand == 0 and (agg != "max" or cand % H == 0):
                tk = cand
            cand += 128
    nk = EH // tk
    mpt = (tk // H) if agg == "max" else 0          # whole members per K tile
    b2_cols = mpt * O_pad if agg == "max" else O_pad
    single_buf = (nk == 1)                           # weight index maps constant

    # ---- zero-pad x to (B_pad, D_pad); padded rows/cols are sliced off -------
    if B_pad != B or D_pad != D:
        x_in = jnp.pad(x.astype(jnp.float32), ((0, B_pad - B), (0, D_pad - D)))
    else:
        x_in = x.astype(jnp.float32)

    # ---- VMEM budget & cost estimate -----------------------------------------
    wsz = jnp.dtype(cdt).itemsize
    nbuf_w = 1 if single_buf else 2
    vmem_bytes = (tb * D_pad * 4 * 2                 # x tile (double-buffered f32)
                  + D_pad * tk * wsz * nbuf_w        # W1 tile
                  + tk * 4 * nbuf_w                  # b1 tile
                  + tk * O_pad * wsz * nbuf_w        # W2 tile
                  + b2_cols * 4 * nbuf_w             # b2 tile
                  + tb * O_pad * 4 * 2               # out tile
                  + tb * O_pad * 4                   # f32 accumulator scratch
                  + tb * tk * (4 + wsz))             # h (f32) + its bf16 copy
    vmem_limit = int(min(max(2 * vmem_bytes, 16 << 20), 64 << 20))

    flops = 2 * B_pad * D_pad * EH + 2 * B_pad * EH * O_pad
    bytes_accessed = (B_pad * D_pad * 4 + D_pad * EH * wsz + EH * 4
                      + EH * O_pad * wsz + (E * O_pad if agg == "max" else O_pad) * 4
                      + B_pad * O_pad * 4)
    cost = pl.CostEstimate(flops=flops, transcendentals=0,
                           bytes_accessed=bytes_accessed)

    kernel = functools.partial(
        _ensemble_kernel, agg=agg, members_per_tile=mpt, hidden=H,
        o_pad=O_pad, compute_dtype=cdt)

    b2_map = (lambda i, k: (0, k)) if agg == "max" else (lambda i, k: (0, 0))

    out_padded = pl.pallas_call(
        kernel,
        out_shape=jax.ShapeDtypeStruct((B_pad, O_pad), jnp.float32),
        grid_spec=pltpu.PrefetchScalarGridSpec(
            num_scalar_prefetch=0,
            grid=(nb, nk),
            in_specs=[
                pl.BlockSpec((tb, D_pad), lambda i, k: (i, 0)),          # x (f32)
                _weight_spec((D_pad, tk), lambda i, k: (0, k), single_buf),   # W1
                _weight_spec((1, tk), lambda i, k: (0, k), single_buf),       # b1
                _weight_spec((tk, O_pad), lambda i, k: (k, 0), single_buf),   # W2
                _weight_spec((1, b2_cols), b2_map, single_buf),               # b2
            ],
            out_specs=pl.BlockSpec((tb, O_pad), lambda i, k: (i, 0)),
            scratch_shapes=[pltpu.VMEM((tb, O_pad), jnp.float32)],
        ),
        compiler_params=pltpu.CompilerParams(
            dimension_semantics=("parallel", "arbitrary"),
            vmem_limit_bytes=vmem_limit,
        ),
        cost_estimate=cost,
    )(x_in, w1f, b1f, w2f, b2f)

    return out_padded[:B, :O]


def ensemble_reference(x, params, aggregation_method="mean", ensemble_weights=None,
                       compute_dtype=jnp.bfloat16):
    """Pure-JAX reference mirroring the PyTorch forward (same bf16 matmul operands)."""
    w1, b1, w2, b2 = params
    E = w1.shape[0]
    h = jnp.einsum("bd,edh->ebh", x.astype(compute_dtype), w1.astype(compute_dtype),
                   preferred_element_type=jnp.float32)
    h = jnp.maximum(h + b1[:, None, :], 0.0)
    outs = jnp.einsum("ebh,eho->ebo", h.astype(compute_dtype),
                      w2.astype(compute_dtype),
                      preferred_element_type=jnp.float32) + b2[:, None, :]
    if aggregation_method == "mean":
        return jnp.mean(outs, axis=0)
    if aggregation_method == "weighted":
        if ensemble_weights is None:
            ensemble_weights = jnp.ones((E,), jnp.float32) / E
        w = jax.nn.softmax(ensemble_weights.astype(jnp.float32), axis=0)
        return jnp.sum(outs * w[:, None, None], axis=0)
    if aggregation_method == "max":
        return jnp.max(outs, axis=0)
    raise ValueError(aggregation_method)


def init_params(key, E, D, H, O):
    """Deterministic synthetic parameter init (PyTorch-Linear-like uniform scale)."""
    k1, k2, k3, k4 = jax.random.split(key, 4)
    s1 = 1.0 / jnp.sqrt(D)
    s2 = 1.0 / jnp.sqrt(H)
    w1 = jax.random.uniform(k1, (E, D, H), jnp.float32, -s1, s1)
    b1 = jax.random.uniform(k2, (E, H), jnp.float32, -s1, s1)
    w2 = jax.random.uniform(k3, (E, H, O), jnp.float32, -s2, s2)
    b2 = jax.random.uniform(k4, (E, O), jnp.float32, -s2, s2)
    return w1, b1, w2, b2


if __name__ == "__main__":
    key = jax.random.PRNGKey(0)
    kx, kp, kw, kx2 = jax.random.split(key, 4)

    E, B, D, H, O = 4, 8, 32, 64, 32
    x = jax.random.normal(kx, (B, D), dtype=jnp.float32)
    params = init_params(kp, E, D, H, O)
    # Non-uniform learned logits so 'weighted' actually differs from 'mean'.
    ens_logits = jax.random.normal(kw, (E,), dtype=jnp.float32)

    ok = True

    # Resident-weight (single K step) path, all three aggregations.
    for agg in ("mean", "weighted", "max"):
        ew = ens_logits if agg == "weighted" else None
        prepared = prepare_ensemble(params, agg, ew)      # fused weights built once
        out = jax.block_until_ready(ensemble_forward(x, prepared))
        ref = ensemble_reference(x, params, agg, ew)
        if out.shape != ref.shape or not jnp.allclose(out, ref, atol=2e-2, rtol=2e-2):
            ok = False

    # K-tiled accumulator path + non-divisible batch (cdiv padding, 2x2 grid).
    x2 = jax.random.normal(kx2, (12, D), dtype=jnp.float32)
    for agg in ("mean", "max"):
        prepared = prepare_ensemble(params, agg)
        out = jax.block_until_ready(
            ensemble_forward(x2, prepared, batch_block=8, k_block=128))
        ref = ensemble_reference(x2, params, agg)
        if out.shape != ref.shape or not jnp.allclose(out, ref, atol=2e-2, rtol=2e-2):
            ok = False

    if ok:
        print("KERNEL_OK")
</pallas_src>

<mosaic_0001>
module attributes {stable_mosaic.version = 11 : i64} {
  func.func @_ensemble_kernel(%arg0: i32, %arg1: i32, %arg2: memref<8x128xf32, #tpu.memory_space<vmem>>, %arg3: memref<128x256xbf16, #tpu.memory_space<vmem>>, %arg4: memref<1x256xf32, #tpu.memory_space<vmem>>, %arg5: memref<256x128xbf16, #tpu.memory_space<vmem>>, %arg6: memref<1x128xf32, #tpu.memory_space<vmem>>, %arg7: memref<8x128xf32, #tpu.memory_space<vmem>>, %arg8: memref<8x128xf32, #tpu.memory_space<vmem>>) attributes {dimension_semantics = [#tpu.dimension_semantics<parallel>, #tpu.dimension_semantics<arbitrary>], iteration_bounds = array<i64: 1, 1>, scalar_prefetch = 0 : i64, scratch_operands = 1 : i64, tpu.core_type = #tpu.core_type<tc>, window_params = [{transform_indices = @transform_0, window_bounds = array<i64: 8, 128>}, {pipeline_mode = #tpu.pipeline_mode<synchronous>, transform_indices = @transform_1, window_bounds = array<i64: 128, 256>}, {pipeline_mode = #tpu.pipeline_mode<synchronous>, transform_indices = @transform_2, window_bounds = array<i64: 1, 256>}, {pipeline_mode = #tpu.pipeline_mode<synchronous>, transform_indices = @transform_3, window_bounds = array<i64: 256, 128>}, {pipeline_mode = #tpu.pipeline_mode<synchronous>, transform_indices = @transform_4, window_bounds = array<i64: 1, 128>}, {transform_indices = @transform_5, window_bounds = array<i64: 8, 128>}]} {
    %c0_i32 = arith.constant 0 : i32
    %0 = arith.cmpi eq, %arg1, %c0_i32 : i32
    %1 = arith.extui %0 : i1 to i32
    %c0_i32_0 = arith.constant 0 : i32
    %2 = arith.cmpi ne, %1, %c0_i32_0 : i32
    scf.if %2 {
      %cst_16 = arith.constant 0.000000e+00 : f32
      %21 = vector.broadcast %cst_16 : f32 to vector<8x128xf32>
      %c0_17 = arith.constant 0 : index
      %c0_18 = arith.constant 0 : index
      %22 = vector.load %arg8[%c0_17, %c0_18] : memref<8x128xf32, #tpu.memory_space<vmem>>, vector<8x128xf32>
      tpu.vector_store %arg8[%c0_17, %c0_18], %21 {strides = array<i32>} : memref<8x128xf32, #tpu.memory_space<vmem>>, vector<8x128xf32>,
    } else {
    }
    %c0 = arith.constant 0 : index
    %c0_1 = arith.constant 0 : index
    %3 = vector.load %arg2[%c0, %c0_1] : memref<8x128xf32, #tpu.memory_space<vmem>>, vector<8x128xf32>
    %4 = arith.truncf %3 : vector<8x128xf32> to vector<8x128xbf16>
    %c0_2 = arith.constant 0 : index
    %c0_3 = arith.constant 0 : index
    %5 = vector.load %arg3[%c0_2, %c0_3] : memref<128x256xbf16, #tpu.memory_space<vmem>>, vector<128x256xbf16>
    %cst = arith.constant dense<0.000000e+00> : vector<8x256xf32>
    %6 = tpu.matmul %4, %5, %cst {dimension_numbers = #tpu.dot_dimension_numbers<[1], [0], [0], [1], [0, 0, 1, 1], [], []>} : vector<8x128xbf16>, vector<128x256xbf16>, vector<8x256xf32> -> vector<8x256xf32>
    %c0_4 = arith.constant 0 : index
    %c0_5 = arith.constant 0 : index
    %7 = vector.load %arg4[%c0_4, %c0_5] : memref<1x256xf32, #tpu.memory_space<vmem>>, vector<1x256xf32>
    %8 = vector.broadcast %7 : vector<1x256xf32> to vector<8x256xf32>
    %9 = arith.addf %6, %8 : vector<8x256xf32>
    %cst_6 = arith.constant 0.000000e+00 : f32
    %10 = vector.broadcast %cst_6 : f32 to vector<8x256xf32>
    %11 = arith.maximumf %9, %10 : vector<8x256xf32>
    %12 = arith.truncf %11 : vector<8x256xf32> to vector<8x256xbf16>
    %c0_7 = arith.constant 0 : index
    %c0_8 = arith.constant 0 : index
    %13 = vector.load %arg8[%c0_7, %c0_8] : memref<8x128xf32, #tpu.memory_space<vmem>>, vector<8x128xf32>
    %c0_9 = arith.constant 0 : index
    %c0_10 = arith.constant 0 : index
    %14 = vector.load %arg5[%c0_9, %c0_10] : memref<256x128xbf16, #tpu.memory_space<vmem>>, vector<256x128xbf16>
    %cst_11 = arith.constant dense<0.000000e+00> : vector<8x128xf32>
    %15 = tpu.matmul %12, %14, %cst_11 {dimension_numbers = #tpu.dot_dimension_numbers<[1], [0], [0], [1], [0, 0, 1, 1], [], []>} : vector<8x256xbf16>, vector<256x128xbf16>, vector<8x128xf32> -> vector<8x128xf32>
    %16 = arith.addf %13, %15 : vector<8x128xf32>
    %c0_12 = arith.constant 0 : index
    %c0_13 = arith.constant 0 : index
    %17 = vector.load %arg8[%c0_12, %c0_13] : memref<8x128xf32, #tpu.memory_space<vmem>>, vector<8x128xf32>
    tpu.vector_store %arg8[%c0_12, %c0_13], %16 {strides = array<i32>} : memref<8x128xf32, #tpu.memory_space<vmem>>, vector<8x128xf32>,
    %c0_i32_14 = arith.constant 0 : i32
    %18 = arith.cmpi eq, %arg1, %c0_i32_14 : i32
    %19 = arith.extui %18 : i1 to i32
    %c0_i32_15 = arith.constant 0 : i32
    %20 = arith.cmpi ne, %19, %c0_i32_15 : i32
    scf.if %20 {
      %c0_16 = arith.constant 0 : index
      %c0_17 = arith.constant 0 : index
      %21 = vector.load %arg8[%c0_16, %c0_17] : memref<8x128xf32, #tpu.memory_space<vmem>>, vector<8x128xf32>
      %c0_18 = arith.constant 0 : index
      %c0_19 = arith.constant 0 : index
      %22 = vector.load %arg6[%c0_18, %c0_19] : memref<1x128xf32, #tpu.memory_space<vmem>>, vector<1x128xf32>
      %23 = vector.broadcast %22 : vector<1x128xf32> to vector<8x128xf32>
      %24 = arith.addf %21, %23 : vector<8x128xf32>
      %c0_20 = arith.constant 0 : index
      %c0_21 = arith.constant 0 : index
      %25 = vector.load %arg7[%c0_20, %c0_21] : memref<8x128xf32, #tpu.memory_space<vmem>>, vector<8x128xf32>
      tpu.vector_store %arg7[%c0_20, %c0_21], %24 {strides = array<i32>} : memref<8x128xf32, #tpu.memory_space<vmem>>, vector<8x128xf32>,
    } else {
    }
    return
  }
  func.func @transform_0(%arg0: i32, %arg1: i32) -> (i32, i32) {
    %c0_i32 = arith.constant 0 : i32
    %c0_i32_0 = arith.constant 0 : i32
    return %arg0, %c0_i32 : i32, i32
  }
  func.func @transform_1(%arg0: i32, %arg1: i32) -> (i32, i32) {
    %c0_i32 = arith.constant 0 : i32
    %c0_i32_0 = arith.constant 0 : i32
    return %c0_i32, %arg1 : i32, i32
  }
  func.func @transform_2(%arg0: i32, %arg1: i32) -> (i32, i32) {
    %c0_i32 = arith.constant 0 : i32
    %c0_i32_0 = arith.constant 0 : i32
    return %c0_i32, %arg1 : i32, i32
  }
  func.func @transform_3(%arg0: i32, %arg1: i32) -> (i32, i32) {
    %c0_i32 = arith.constant 0 : i32
    %c0_i32_0 = arith.constant 0 : i32
    return %arg1, %c0_i32 : i32, i32
  }
  func.func @transform_4(%arg0: i32, %arg1: i32) -> (i32, i32) {
    %c0_i32 = arith.constant 0 : i32
    %c0_i32_0 = arith.constant 0 : i32
    %c0_i32_1 = arith.constant 0 : i32
    return %c0_i32, %c0_i32_0 : i32, i32
  }
  func.func @transform_5(%arg0: i32, %arg1: i32) -> (i32, i32) {
    %c0_i32 = arith.constant 0 : i32
    %c0_i32_0 = arith.constant 0 : i32
    return %arg0, %c0_i32 : i32, i32
  }
}

</mosaic_0001>

<bundles_post_ra>
// kernel: tpu_custom_call.1
= control target key start
LH: loop header
LB: loop body
LE: loop exit
PB: predicated region body
PF: predicated region fallthrough
CT: control target
= control target key end

     0   :  { %10 = vsyncpa [#allocation4], 0  ;;  %s668_s0 = inlined_call_operand.hbm [shape: f32[8,128], index: 0, kind: input, shape index: {}]   ;;  %s669_s1 = inlined_call_operand.hbm [shape: bf16[128,256], index: 1, kind: input, shape index: {}]   ;;  %s670_s2 = inlined_call_operand.vmem [shape: f32[1,256], index: 2, kind: input, shape index: {}]   ;;  %s671_s3 = inlined_call_operand.hbm [shape: bf16[256,128], index: 3, kind: input, shape index: {}]   ;;  %s672_s4 = inlined_call_operand.vmem [shape: f32[1,128], index: 4, kind: input, shape index: {}]   ;;  %s673_s5 = inlined_call_operand.hbm [shape: f32[8,128], index: 5, kind: output, shape index: {}]  }
   0x1   :  { %11 = vsyncpa [#allocation7], 0 }
   0x2   :  { %12 = vsyncpa [#allocation5], 0  ;;  %s611_s18 = smov [#allocation6]  }
   0x3   :  { %s28_s19 = sshll.u32 %s611_s18, 4  ;;  %s29_s19 = int_to_ptr.vmem [resolvable:$true] %s28_s19 }
   0x4   :  { %s533_s20 = scalar_lea.vmem %s29_s19, 2048  ;;  %p538_p1 = scmp.lt.s32.totalorder %s29_s19, %s29_s19 }
   0x5   :  { %p534_p0 = scmp.ne.s32.totalorder %s29_s19, %s533_s20  ;;  %p539_p2 = scmp.lt.s32.totalorder %s533_s20, %s533_s20 }
   0x7   :  { %p540_p3 = por %p539_p2, %p538_p1 }
   0x9   :  { %p541_p4 = pnand %p540_p3, %p534_p0 }
   0xb   :  { %544 = shalt.err (!%p541_p4)
}
   0xc   :  { %s612_s21 = smov 128   ;;  %s613_s22 = smov 8  }
   0xd   :  { %34 = dma.hbm_to_vmem [thread:$0]  %s669_s1, 2048, %s29_s19, [#allocation7], %s612_s21, %s612_s21, %s613_s22  }
   0xe   :  { %s614_s25 = smov [#allocation3]   ;;  %s615_s27 = smov [#allocation8]  }
   0xf   :  { %s19_s26 = sshll.u32 %s614_s25, 4  ;;  %s42_s28 = sshll.u32 %s615_s27, 4  ;;  %s20_s26 = int_to_ptr.vmem [resolvable:$true] %s19_s26  ;;  %s43_s28 = int_to_ptr.vmem [resolvable:$true] %s42_s28 }
  0x10   :  { %s553_s29 = scalar_lea.vmem %s20_s26, 128  ;;  %p558_p6 = scmp.lt.s32.totalorder %s20_s26, %s20_s26 }
  0x11   :  { %p554_p5 = scmp.ne.s32.totalorder %s20_s26, %s553_s29  ;;  %p559_p7 = scmp.lt.s32.totalorder %s553_s29, %s553_s29 }
  0x13   :  { %p560_p8 = por %p559_p7, %p558_p6 }
  0x15   :  { %p561_p9 = pnand %p560_p8, %p554_p5 }
  0x17   :  { %564 = shalt.err (!%p561_p9)
}
  0x18   :  { %22 = dma.hbm_to_vmem [thread:$0]  %s668_s0, 128, %s20_s26, [#allocation4]  }
  0x19   :  { %s573_s7 = scalar_lea.vmem %s43_s28, 2048  ;;  %p578_p11 = scmp.lt.s32.totalorder %s43_s28, %s43_s28 }
  0x1a   :  { %p574_p10 = scmp.ne.s32.totalorder %s43_s28, %s573_s7  ;;  %p579_p12 = scmp.lt.s32.totalorder %s573_s7, %s573_s7 }
  0x1c   :  { %p580_p13 = por %p579_p12, %p578_p11 }
  0x1e   :  { %p581_p0 = pnand %p580_p13, %p574_p10 }
  0x20   :  { %584 = shalt.err (!%p581_p0)
}
  0x21   :  { %s616_s1 = smov 64   ;;  %s617_s8 = smov 4  }
  0x22   :  { %48 = dma.hbm_to_vmem [thread:$0]  %s671_s3, 2048, %s43_s28, [#allocation7], %s616_s1, %s616_s1, %s617_s8  }
  0x23   :  { %605 = dma.done.wait [#allocation4], 128  }
  0x24   :  { %606 = vsyncadd [#allocation4], 4294967168 }
  0x25   :  { %607 = dma.done.wait [#allocation7], 4096  }
  0x26   :  { %608 = vsyncadd [#allocation7], 4294963200  ;;  %v618_v0 = vmov 0   ;;  %v485_v1 = vld [vmem:[#allocation6 + $0x74] ss:$8 sps:$4 sm:$0xff]   ;;  %v513_v15 = vld [vmem:[#allocation8 + $0x68] sm:$0xff]   ;;  %v86_v35 = vlaneseq }
  0x27   :  { %208 = vmatprep.mubr.bf16.mxu0 %v618_v0  ;;  %v487_v2 = vld [vmem:[#allocation6 + $0x70] ss:$8 sps:$4 sm:$0xff]   ;;  %176 = vmatprep.subr.bf16.mxu0 %v485_v1  ;;  %v488_v3 = vld [vmem:[#allocation6 + $0x64] ss:$8 sps:$4 sm:$0xff]   ;;  %v490_v4 = vld [vmem:[#allocation6 + $0x60] ss:$8 sps:$4 sm:$0xff]  }
  0x28   :  { %177 = vmatpush1.bf16.msra.mxu0 %v487_v2  ;;  %v491_v5 = vld [vmem:[#allocation6 + $0x54] ss:$8 sps:$4 sm:$0xff]   ;;  %v493_v6 = vld [vmem:[#allocation6 + $0x50] ss:$8 sps:$4 sm:$0xff]   ;;  %v494_v7 = vld [vmem:[#allocation6 + $0x44] ss:$8 sps:$4 sm:$0xff]  }
  0x29   :  { %178 = vmatprep.subr.bf16.mxu0 %v488_v3  ;;  %v496_v8 = vld [vmem:[#allocation6 + $0x40] ss:$8 sps:$4 sm:$0xff]   ;;  %v497_v9 = vld [vmem:[#allocation6 + $0x34] ss:$8 sps:$4 sm:$0xff]   ;;  %v499_v12 = vld [vmem:[#allocation6 + $0x30] ss:$8 sps:$4 sm:$0xff]  }
  0x2a   :  { %v509_v10 = vld [vmem:[#allocation8 + $0x78] sm:$0xff]   ;;  %v511_v13 = vld [vmem:[#allocation8 + $0x70] sm:$0xff]   ;;  %v500_v16 = vld [vmem:[#allocation6 + $0x24] ss:$8 sps:$4 sm:$0xff]   ;;  %v87_v36 = vshrl.u32 %v86_v35, 7 }
  0x2b   :  { %v510_v11 = vld [vmem:[#allocation8 + $0x38] sm:$0xff]   ;;  %454 = vmatprep.subr.bf16.mxu1 %v509_v10  ;;  %v512_v14 = vld [vmem:[#allocation8 + $0x30] sm:$0xff]   ;;  %v502_v17 = vld [vmem:[#allocation6 + $0x20] ss:$8 sps:$4 sm:$0xff]  }
  0x2c   :  { %179 = vmatpush1.bf16.msra.mxu0 %v490_v4  ;;  %455 = vmatpush3.bf16.msra.mxu1 %v510_v11  ;;  %v514_v18 = vld [vmem:[#allocation8 + $0x28] sm:$0xff]   ;;  %v515_v19 = vld [vmem:[#allocation8 + $0x60] sm:$0xff]   ;;  %v503_v20 = vld [vmem:[#allocation6 + $0x14] ss:$8 sps:$4 sm:$0xff]   ;;  %v88_v37 = vsub.s32 0, %v87_v36  ;;  %v92_v39 = vsub.s32 1, %v87_v36 }
  0x2d   :  { %180 = vmatprep.subr.bf16.mxu0 %v491_v5  ;;  %456 = vmatprep.subr.bf16.mxu1 %v511_v13  ;;  %v505_v21 = vld [vmem:[#allocation6 + $0x10] ss:$8 sps:$4 sm:$0xff]   ;;  %v506_v22 = vld [vmem:[#allocation6 + $0x4] ss:$8 sps:$4 sm:$0xff]   ;;  %v508_v26 = vld [vmem:[#allocation6] ss:$8 sps:$4 sm:$0xff]  }
  0x2e   :  { %v516_v23 = vld [vmem:[#allocation8 + $0x20] sm:$0xff]   ;;  %v517_v24 = vld [vmem:[#allocation8 + $0x58] sm:$0xff]   ;;  %v519_v28 = vld [vmem:[#allocation8 + $0x50] sm:$0xff]  }
  0x2f   :  { %v518_v25 = vld [vmem:[#allocation8 + $0x18] sm:$0xff]   ;;  %v520_v30 = vld [vmem:[#allocation8 + $0x10] sm:$0xff]   ;;  %v521_v31 = vld [vmem:[#allocation8 + $0x48] sm:$0xff]  }
  0x30   :  { %181 = vmatpush1.bf16.msra.mxu0 %v493_v6  ;;  %457 = vmatpush3.bf16.msra.mxu1 %v512_v14  ;;  %v66_v27 = vld [vmem:[#allocation3] sm:$0xff]  ;;  %v522_v32 = vld [vmem:[#allocation8 + $0x8] sm:$0xff]   ;;  %v523_v33 = vld [vmem:[#allocation8 + $0x40] sm:$0xff]  }
  0x31   :  { %182 = vmatprep.subr.bf16.mxu0 %v494_v7  ;;  %458 = vmatprep.subr.bf16.mxu1 %v513_v15  ;;  %v67_v29 = vpack.c.bf16 %v66_v27, %v66_v27  ;;  %v524_v34 = vld [vmem:[#allocation8] sm:$0xff]   ;;  %v84_v38 = vld [vmem:[%s670_s2] sm:$0x3]  ;;  %s619_s2 = smov [#allocation9]  }
  0x32   :  { %v89_v40 = vrot.slane %v84_v38, %v88_v37  ;;  %v93_v41 = vrot.slane %v84_v38, %v92_v39  ;;  %v453_v54 = vld [vmem:[%s672_s4] ss:$0 sm:$0xff]  ;;  %s411_s13 = sshll.u32 %s619_s2, 4  ;;  %s412_s13 = int_to_ptr.vmem [resolvable:$true] %s411_s13 }
  0x33   :  { %s585_s14 = scalar_lea.vmem %s412_s13, 128  ;;  %p590_p2 = scmp.lt.s32.totalorder %s412_s13, %s412_s13 }
  0x34   :  { %183 = vmatpush1.bf16.msra.mxu0 %v496_v8  ;;  %459 = vmatpush3.bf16.msra.mxu1 %v514_v18  ;;  %p586_p1 = scmp.ne.s32.totalorder %s412_s13, %s585_s14  ;;  %p591_p3 = scmp.lt.s32.totalorder %s585_s14, %s585_s14 }
  0x35   :  { %184 = vmatprep.subr.bf16.mxu0 %v497_v9  ;;  %460 = vmatprep.subr.bf16.mxu1 %v515_v19 }
  0x36   :  { %p592_p4 = por %p591_p3, %p590_p2 }
  0x38   :  { %185 = vmatpush1.bf16.msra.mxu0 %v499_v12  ;;  %461 = vmatpush3.bf16.msra.mxu1 %v516_v23  ;;  %p593_p5 = pnand %p592_p4, %p586_p1 }
  0x39   :  { %186 = vmatprep.subr.bf16.mxu0 %v500_v16  ;;  %462 = vmatprep.subr.bf16.mxu1 %v517_v24 }
  0x3c   :  { %187 = vmatpush1.bf16.msra.mxu0 %v502_v17  ;;  %463 = vmatpush3.bf16.msra.mxu1 %v518_v25 }
  0x3d   :  { %188 = vmatprep.subr.bf16.mxu0 %v503_v20  ;;  %464 = vmatprep.subr.bf16.mxu1 %v519_v28 }
  0x40   :  { %189 = vmatpush1.bf16.msra.mxu0 %v505_v21  ;;  %465 = vmatpush3.bf16.msra.mxu1 %v520_v30 }
  0x41   :  { %190 = vmatprep.subr.bf16.mxu0 %v506_v22  ;;  %466 = vmatprep.subr.bf16.mxu1 %v521_v31 }
  0x44   :  { %191 = vmatpush1.bf16.msra.mxu0 %v508_v26  ;;  %467 = vmatpush3.bf16.msra.mxu1 %v522_v32 }
  0x45   :  { %468 = vmatprep.subr.bf16.mxu1 %v523_v33 }
  0x47   :  { %209 = vmatmul.mubr.bf16.vlgmr.msra.gmra.mxu0 %v67_v29 }
  0x48   :  { %469 = vmatpush3.bf16.msra.mxu1 %v524_v34 }
 0x107   :  { %v210_v42 = vpop.f32.mrf.mxu0 }
 0x108   :  { %v211_v43 = vadd.f32 %v210_v42, %v89_v40 }
 0x109   :  { %v212_v44 = vpop.f32.mrf.mxu0 }
 0x10a   :  { %v213_v45 = vadd.f32 %v212_v44, %v93_v41  ;;  %v217_v46 = vmax.f32 %v211_v43, 0.0 }
 0x10b   :  { %v214_v47 = vpop.f32.mrf.mxu0 }
 0x10c   :  { %v218_v48 = vmax.f32 %v213_v45, 0.0  ;;  %v219_v51 = vpack.c.bf16 %v217_v46, %v217_v46 }
 0x10d   :  { %v215_v49 = vpop.f32.mrf.mxu0 }
 0x10e   :  { %v220_v50 = vpack.c.bf16 %v218_v48, %v218_v48 }
 0x110   :  { %382 = vmatprep.mubr.bf16.mxu1 %v220_v50 }
 0x111   :  { %383 = vmatmul.mubr.bf16.vlgmr.msra.gmra.mxu1 %v219_v51 }
 0x1d1   :  { %v470_v52 = vpop.f32.mrf.mxu1 }
 0x1d3   :  { %v471_v53 = vpop.f32.mrf.mxu1 }
 0x1d4   :  { %v472_v55 = vadd.f32 %v471_v53, %v470_v52 }
 0x1d5   :  { %v473_v56 = vpop.f32.mrf.mxu1 }
 0x1d6   :  { %v403_v57 = vadd.f32 %v472_v55, %v453_v54 }
 0x1d7   :  { %v474_v58 = vpop.f32.mrf.mxu1 }
 0x1d8   :  { %404 = vst [vmem:[#allocation9] sm:$0xff] %v403_v57 }
 0x1d9   :  { %596 = shalt.err (!%p593_p5)
}
 0x1da   :  { %414 = dma.vmem_to_hbm [thread:$0]  %s412_s13, 128, %s673_s5, [#allocation5]  }
 0x1db   :  { %609 = dma.done.wait [#allocation5], 128  }
 0x1dc   :  { %610 = vsyncadd [#allocation5], 4294967168 }
 0x1dd   :  { %418 = vsyncpa [#allocation4], 1 }
 0x1de   :  { %419 = vsyncpa [#allocation7], 1 }
 0x1df   :  { %420 = vsyncpa [#allocation5], 1 }

</bundles_post_ra>
